<compile_context>
chip_gen: v7x
topology: tpu7x:2x2x1
jax: 0.10.0
libtpu: 0.0.40
codegen_flags: <defaults>
</compile_context>

<pallas_src>
import math
import numpy as np
import jax
import jax.numpy as jnp
from jax import lax
from jax.experimental import pallas as pl
from jax.experimental.pallas import tpu as pltpu

# ---- synthetic module hyper-parameters (small, consistent with the forward) ----
F_FIELDS = 2      # note-event token fields (field 0 drives the key-padding mask)
SEQ      = 8      # sequence length
BATCH    = 2      # batch size (power of 2 -> in-kernel mask uses bitwise AND)
D_MODEL  = 32     # embedding / model width
D_FF     = 64     # feed-forward width
D_OUT    = 16     # head output width
VOCAB    = 32     # vocabulary size per field
PAD_TOKEN = 0
EPS = 1e-5

assert BATCH & (BATCH - 1) == 0, "in-kernel batch mask assumes power-of-two batch"
assert 0 <= PAD_TOKEN < VOCAB    # pad marker column must come from the field-0 rows only

N_TOK = SEQ * BATCH              # flattened token count (seq-major: j = s*B + b) = 16
V2 = F_FIELDS * VOCAB            # rows of the packed embedding table = 64
NEG_BIG = -1e30                  # "minus infinity" without inf arithmetic (f32 only)

# ---- single merged weight-slab layout (all block starts 128-aligned) ----
D = D_MODEL
P_OFF, P_W = 0, 6 * D            # fused projection RHS: (64, 192)
X_REL, V_REL, Q_REL, K_REL = 0, D, 2 * D, 4 * D
AUG_W = 2 * D                    # width of the augmented q / k blocks (64)
ONES_COL = Q_REL + D             # constant-1 column (comes from the bias row)
PAD_COL = K_REL + D              # -1e9 * is_pad column (comes from the packed table)
W2_OFF = 256                     # (64, 32)
WO_OFF = 384                     # (32, 32)
W1_OFF = 512                     # (32, 64)
WH_OFF = 640                     # (32, 16)
B_OFF, B_W = 768, 192            # bias / LN block: rows 0..8
SLAB_ROWS, SLAB_COLS = V2, 960
PB_ROW, BO_ROW, G1_ROW, BE1_ROW, B1_ROW, B2_ROW, G2_ROW, BE2_ROW, BH_ROW = range(9)


def _layernorm(h, g, b):
    mu = jnp.mean(h, axis=-1, keepdims=True)
    var = jnp.mean((h - mu) ** 2, axis=-1, keepdims=True)
    return (h - mu) * lax.rsqrt(var + EPS) * g + b


def fused_note_events_kernel(tok_ref, w_ref, out_ref):
    """Embedding + masked single-head self-attention + FFN + head, whole batch, one invocation."""
    f32, bf16 = jnp.float32, jnp.bfloat16

    tok0 = tok_ref[:, 0:1]                                  # (N, 1) primary field
    tok1 = tok_ref[:, 1:2]                                  # (N, 1) secondary field

    # one-hot over the packed two-field vocab (exact in bf16)
    v_iota = lax.broadcasted_iota(jnp.int32, (N_TOK, V2), 1)
    hit = (v_iota == tok0) | (v_iota == tok1 + VOCAB)
    onehot = hit.astype(f32).astype(bf16)                   # (N, 2V)

    # ---- single fused MXU matmul: [x | v | q_aug | k_aug] = onehot @ P (+ packed bias row) ----
    p_w = w_ref[:, P_OFF:P_OFF + P_W].astype(bf16)          # (2V, 192)
    proj = jnp.dot(onehot, p_w, preferred_element_type=f32) # (N, 192), f32 accumulate
    proj = proj + w_ref[PB_ROW:PB_ROW + 1, B_OFF:B_OFF + P_W]

    x = proj[:, X_REL:X_REL + D]                            # residual stream, stays f32
    v = proj[:, V_REL:V_REL + D].astype(bf16)
    q_aug = proj[:, Q_REL:Q_REL + AUG_W].astype(bf16)       # [q/sqrt(D) | 1 | 0...]
    k_aug = proj[:, K_REL:K_REL + AUG_W].astype(bf16)       # [k | -1e9*is_pad | 0...]

    # ---- scores: scaling + key-padding penalty folded into one MXU op ----
    scores = lax.dot_general(q_aug, k_aug, (((1,), (1,)), ((), ())),
                             preferred_element_type=f32)    # (N, N), f32

    # block-diagonal same-batch mask generated in-kernel (seq-major flatten -> batch id = idx & (B-1))
    ri = lax.broadcasted_iota(jnp.int32, (N_TOK, N_TOK), 0)
    ci = lax.broadcasted_iota(jnp.int32, (N_TOK, N_TOK), 1)
    same_batch = (ri & (BATCH - 1)) == (ci & (BATCH - 1))
    scores = jnp.where(same_batch, scores, f32(NEG_BIG))

    # softmax strictly in f32
    m = jnp.max(scores, axis=-1, keepdims=True)
    e = jnp.exp(scores - m)
    attn = e * pl.reciprocal(jnp.sum(e, axis=-1, keepdims=True), approx=True)

    ctx = jnp.dot(attn.astype(bf16), v, preferred_element_type=f32)          # (N, D)
    wo = w_ref[0:D, WO_OFF:WO_OFF + D].astype(bf16)
    attn_out = jnp.dot(ctx.astype(bf16), wo, preferred_element_type=f32) \
        + w_ref[BO_ROW:BO_ROW + 1, B_OFF:B_OFF + D]

    # ---- residual + LN, FFN, residual + LN (all f32) ----
    h1 = _layernorm(x + attn_out,
                    w_ref[G1_ROW:G1_ROW + 1, B_OFF:B_OFF + D],
                    w_ref[BE1_ROW:BE1_ROW + 1, B_OFF:B_OFF + D])

    w1 = w_ref[0:D, W1_OFF:W1_OFF + D_FF].astype(bf16)
    ff = jnp.dot(h1.astype(bf16), w1, preferred_element_type=f32) \
        + w_ref[B1_ROW:B1_ROW + 1, B_OFF:B_OFF + D_FF]
    ff = jnp.maximum(ff, 0.0)
    w2 = w_ref[:, W2_OFF:W2_OFF + D].astype(bf16)                            # (D_FF, D)
    ff = jnp.dot(ff.astype(bf16), w2, preferred_element_type=f32) \
        + w_ref[B2_ROW:B2_ROW + 1, B_OFF:B_OFF + D]

    h2 = _layernorm(h1 + ff,
                    w_ref[G2_ROW:G2_ROW + 1, B_OFF:B_OFF + D],
                    w_ref[BE2_ROW:BE2_ROW + 1, B_OFF:B_OFF + D])

    # ---- head: store (N, D_OUT) directly (no wrapper slice needed) ----
    wh = w_ref[0:D, WH_OFF:WH_OFF + D_OUT].astype(bf16)
    out_ref[...] = jnp.dot(h2.astype(bf16), wh, preferred_element_type=f32) \
        + w_ref[BH_ROW:BH_ROW + 1, B_OFF:B_OFF + D_OUT]


def pack_params(params):
    """Pack ALL weights / biases / LN params into one lane-aligned (64, 960) f32 slab (host, once)."""
    inv_sqrt_d = 1.0 / math.sqrt(D_MODEL)
    E = np.concatenate([np.asarray(params["emb"][0]),
                        np.asarray(params["emb"][1])], axis=0).astype(np.float32)   # (2V, D)
    slab = np.zeros((SLAB_ROWS, SLAB_COLS), np.float32)

    # fused projection RHS: [x | v | q_aug | k_aug]
    slab[:, P_OFF + X_REL:P_OFF + X_REL + D] = E
    slab[:, P_OFF + V_REL:P_OFF + V_REL + D] = E @ np.asarray(params["wv"])
    slab[:, P_OFF + Q_REL:P_OFF + Q_REL + D] = (E @ np.asarray(params["wq"])) * inv_sqrt_d
    slab[:, P_OFF + K_REL:P_OFF + K_REL + D] = E @ np.asarray(params["wk"])
    slab[PAD_TOKEN, P_OFF + PAD_COL] = -1e9          # key-padding marker (field-0 PAD row only)

    slab[:D_FF, W2_OFF:W2_OFF + D] = np.asarray(params["w2"])
    slab[:D, WO_OFF:WO_OFF + D] = np.asarray(params["wo"])
    slab[:D, W1_OFF:W1_OFF + D_FF] = np.asarray(params["w1"])
    slab[:D, WH_OFF:WH_OFF + D_OUT] = np.asarray(params["wh"])

    # bias / LN block (kept f32 in-kernel; only matmul operands are cast to bf16)
    pb = np.zeros((B_W,), np.float32)
    pb[V_REL:V_REL + D] = np.asarray(params["bv"])[0]
    pb[Q_REL:Q_REL + D] = np.asarray(params["bq"])[0] * inv_sqrt_d
    pb[ONES_COL] = 1.0                               # constant-1 column pairs with the pad column
    pb[K_REL:K_REL + D] = np.asarray(params["bk"])[0]
    slab[PB_ROW, B_OFF:B_OFF + B_W] = pb
    slab[BO_ROW, B_OFF:B_OFF + D] = np.asarray(params["bo"])[0]
    slab[G1_ROW, B_OFF:B_OFF + D] = np.asarray(params["g1"])[0]
    slab[BE1_ROW, B_OFF:B_OFF + D] = np.asarray(params["be1"])[0]
    slab[B1_ROW, B_OFF:B_OFF + D_FF] = np.asarray(params["b1"])[0]
    slab[B2_ROW, B_OFF:B_OFF + D] = np.asarray(params["b2"])[0]
    slab[G2_ROW, B_OFF:B_OFF + D] = np.asarray(params["g2"])[0]
    slab[BE2_ROW, B_OFF:B_OFF + D] = np.asarray(params["be2"])[0]
    slab[BH_ROW, B_OFF:B_OFF + D_OUT] = np.asarray(params["bh"])[0]
    return jnp.asarray(slab)


@jax.jit
def note_events_forward(tokens, slab):
    """tokens: (F, S, B) int32. Returns (S, B, D_OUT) float32 (seq-first, like PyTorch)."""
    F, S, B = tokens.shape
    n = S * B
    assert F == F_FIELDS and n == N_TOK
    # seq-major flatten (row j = s*B + b) so the kernel output reshapes directly to (S, B, D_OUT)
    tok_nf = tokens.reshape(F, n).T.astype(jnp.int32)        # (N, F)

    out = pl.pallas_call(
        fused_note_events_kernel,
        out_shape=jax.ShapeDtypeStruct((n, D_OUT), jnp.float32),
        in_specs=[pl.BlockSpec(memory_space=pltpu.MemorySpace.VMEM),
                  pl.BlockSpec(memory_space=pltpu.MemorySpace.VMEM)],
        out_specs=pl.BlockSpec(memory_space=pltpu.MemorySpace.VMEM),
    )(tok_nf, slab)                                          # 2 input DMAs, gridless

    return out.reshape(S, B, D_OUT)                          # contiguous reshape (no copy)


def reference_forward(tokens, params):
    """Pure-JAX f32 reference with the original module's math, for verification."""
    F, S, B = tokens.shape
    emb = params["emb"][0][tokens[0]]
    for f in range(1, F):
        emb = emb + params["emb"][f][tokens[f]]
    key_pad = (tokens[0] == PAD_TOKEN).T.astype(jnp.float32)            # (B, S)
    x = jnp.transpose(emb, (1, 0, 2)).astype(jnp.float32)               # (B, S, D)

    q = x @ params["wq"] + params["bq"]
    k = x @ params["wk"] + params["bk"]
    v = x @ params["wv"] + params["bv"]
    scores = jnp.einsum("bsd,btd->bst", q, k) / math.sqrt(D_MODEL)
    scores = scores + key_pad[:, None, :] * (-1e9)
    attn = jax.nn.softmax(scores, axis=-1)
    ctx = jnp.einsum("bst,btd->bsd", attn, v)
    attn_out = ctx @ params["wo"] + params["bo"]
    h1 = _layernorm(x + attn_out, params["g1"], params["be1"])
    ff = jnp.maximum(h1 @ params["w1"] + params["b1"], 0.0)
    ff = ff @ params["w2"] + params["b2"]
    h2 = _layernorm(h1 + ff, params["g2"], params["be2"])
    out = h2 @ params["wh"] + params["bh"]                              # (B, S, D_OUT)
    return jnp.transpose(out, (1, 0, 2))


def init_params(key):
    keys = jax.random.split(key, 10)

    def w(k, shape, scale=0.05):
        return (scale * jax.random.normal(k, shape)).astype(jnp.float32)

    return {
        "emb": [w(keys[0], (VOCAB, D_MODEL)), w(keys[1], (VOCAB, D_MODEL))],
        "wq": w(keys[2], (D_MODEL, D_MODEL)), "bq": jnp.zeros((1, D_MODEL), jnp.float32),
        "wk": w(keys[3], (D_MODEL, D_MODEL)), "bk": jnp.zeros((1, D_MODEL), jnp.float32),
        "wv": w(keys[4], (D_MODEL, D_MODEL)), "bv": jnp.zeros((1, D_MODEL), jnp.float32),
        "wo": w(keys[5], (D_MODEL, D_MODEL)), "bo": jnp.zeros((1, D_MODEL), jnp.float32),
        "g1": jnp.ones((1, D_MODEL), jnp.float32), "be1": jnp.zeros((1, D_MODEL), jnp.float32),
        "w1": w(keys[6], (D_MODEL, D_FF)), "b1": jnp.zeros((1, D_FF), jnp.float32),
        "w2": w(keys[7], (D_FF, D_MODEL)), "b2": jnp.zeros((1, D_MODEL), jnp.float32),
        "g2": jnp.ones((1, D_MODEL), jnp.float32), "be2": jnp.zeros((1, D_MODEL), jnp.float32),
        "wh": w(keys[8], (D_MODEL, D_OUT)), "bh": jnp.zeros((1, D_OUT), jnp.float32),
    }


if __name__ == "__main__":
    key = jax.random.PRNGKey(0)
    k_tok, k_par = jax.random.split(key)

    tokens = jax.random.randint(k_tok, (F_FIELDS, SEQ, BATCH), 0, VOCAB, dtype=jnp.int32)
    # force some padding in the primary field so the key-padding mask is exercised
    tokens = tokens.at[0, -2:, 0].set(PAD_TOKEN)

    params = init_params(k_par)
    slab = pack_params(params)            # one-time host-side packing into a single slab

    out = note_events_forward(tokens, slab)
    out = jax.block_until_ready(out)

    ref = reference_forward(tokens, params)
    assert out.shape == (SEQ, BATCH, D_OUT), out.shape
    assert bool(jnp.all(jnp.isfinite(out)))
    # bf16 MXU operands (f32 accumulation + f32 softmax/LN) vs. a pure-f32 reference:
    # expected differences are ~1e-3; 1e-2 tolerance keeps comfortable margin.
    max_err = float(jnp.max(jnp.abs(out - ref)))
    assert bool(jnp.allclose(out, ref, atol=1e-2, rtol=1e-2)), f"mismatch, max abs err {max_err}"

    print("KERNEL_OK")
</pallas_src>

<mosaic_0001>
module attributes {stable_mosaic.version = 11 : i64} {
  func.func @fused_note_events_kernel(%arg0: memref<16x2xi32, #tpu.memory_space<vmem>>, %arg1: memref<64x960xf32, #tpu.memory_space<vmem>>, %arg2: memref<16x16xf32, #tpu.memory_space<vmem>>) attributes {dimension_semantics = [], scalar_prefetch = 0 : i64, scratch_operands = 0 : i64, tpu.core_type = #tpu.core_type<tc>} {
    %c0 = arith.constant 0 : index
    %c0_0 = arith.constant 0 : index
    %0 = vector.load %arg0[%c0, %c0_0] : memref<16x2xi32, #tpu.memory_space<vmem>>, vector<16x1xi32>
    %c0_1 = arith.constant 0 : index
    %c1 = arith.constant 1 : index
    %1 = vector.load %arg0[%c0_1, %c1] : memref<16x2xi32, #tpu.memory_space<vmem>>, vector<16x1xi32>
    %2 = tpu.iota {dimensions = array<i32: 1>} : vector<16x64xi32>
    %3 = vector.broadcast %0 : vector<16x1xi32> to vector<16x64xi32>
    %4 = arith.cmpi eq, %2, %3 : vector<16x64xi32>
    %c32_i32 = arith.constant 32 : i32
    %5 = vector.broadcast %c32_i32 : i32 to vector<16x1xi32>
    %6 = arith.addi %1, %5 : vector<16x1xi32>
    %7 = vector.broadcast %6 : vector<16x1xi32> to vector<16x64xi32>
    %8 = arith.cmpi eq, %2, %7 : vector<16x64xi32>
    %9 = arith.ori %4, %8 : vector<16x64xi1>
    %10 = arith.extui %9 : vector<16x64xi1> to vector<16x64xi32>
    %11 = arith.sitofp %10 : vector<16x64xi32> to vector<16x64xf32>
    %12 = arith.truncf %11 : vector<16x64xf32> to vector<16x64xbf16>
    %c0_2 = arith.constant 0 : index
    %c0_3 = arith.constant 0 : index
    %13 = vector.load %arg1[%c0_2, %c0_3] : memref<64x960xf32, #tpu.memory_space<vmem>>, vector<64x192xf32>
    %14 = arith.truncf %13 : vector<64x192xf32> to vector<64x192xbf16>
    %cst = arith.constant dense<0.000000e+00> : vector<16x192xf32>
    %15 = tpu.matmul %12, %14, %cst {dimension_numbers = #tpu.dot_dimension_numbers<[1], [0], [0], [1], [0, 0, 1, 1], [], []>} : vector<16x64xbf16>, vector<64x192xbf16>, vector<16x192xf32> -> vector<16x192xf32>
    %c0_4 = arith.constant 0 : index
    %c768 = arith.constant 768 : index
    %16 = vector.load %arg1[%c0_4, %c768] : memref<64x960xf32, #tpu.memory_space<vmem>>, vector<1x192xf32>
    %17 = vector.broadcast %16 : vector<1x192xf32> to vector<16x192xf32>
    %18 = arith.addf %15, %17 : vector<16x192xf32>
    %19 = vector.extract_strided_slice %18 {offsets = [0, 0], sizes = [16, 32], strides = [1, 1]} : vector<16x192xf32> to vector<16x32xf32>
    %20 = vector.extract_strided_slice %18 {offsets = [0, 32], sizes = [16, 32], strides = [1, 1]} : vector<16x192xf32> to vector<16x32xf32>
    %21 = arith.truncf %20 : vector<16x32xf32> to vector<16x32xbf16>
    %22 = vector.extract_strided_slice %18 {offsets = [0, 64], sizes = [16, 64], strides = [1, 1]} : vector<16x192xf32> to vector<16x64xf32>
    %23 = arith.truncf %22 : vector<16x64xf32> to vector<16x64xbf16>
    %24 = vector.extract_strided_slice %18 {offsets = [0, 128], sizes = [16, 64], strides = [1, 1]} : vector<16x192xf32> to vector<16x64xf32>
    %25 = arith.truncf %24 : vector<16x64xf32> to vector<16x64xbf16>
    %cst_5 = arith.constant dense<0.000000e+00> : vector<16x16xf32>
    %26 = tpu.matmul %23, %25, %cst_5 {dimension_numbers = #tpu.dot_dimension_numbers<[1], [1], [0], [0], [0, 0, 1, 0], [], []>} : vector<16x64xbf16>, vector<16x64xbf16>, vector<16x16xf32> -> vector<16x16xf32>
    %27 = tpu.iota {dimensions = array<i32: 0>} : vector<16x16xi32>
    %28 = tpu.iota {dimensions = array<i32: 1>} : vector<16x16xi32>
    %c1_i32 = arith.constant 1 : i32
    %29 = vector.broadcast %c1_i32 : i32 to vector<16x16xi32>
    %30 = arith.andi %27, %29 : vector<16x16xi32>
    %c1_i32_6 = arith.constant 1 : i32
    %31 = vector.broadcast %c1_i32_6 : i32 to vector<16x16xi32>
    %32 = arith.andi %28, %31 : vector<16x16xi32>
    %33 = arith.cmpi eq, %30, %32 : vector<16x16xi32>
    %cst_7 = arith.constant -1.000000e+30 : f32
    %34 = vector.broadcast %cst_7 : f32 to vector<16x16xf32>
    %35 = arith.select %33, %26, %34 : vector<16x16xi1>, vector<16x16xf32>
    %cst_8 = arith.constant dense<0xFF800000> : vector<16xf32>
    %36 = vector.multi_reduction <maximumf>, %35, %cst_8 [1] : vector<16x16xf32> to vector<16xf32>
    %37 = vector.shape_cast %36 : vector<16xf32> to vector<16x1xf32>
    %38 = vector.broadcast %37 : vector<16x1xf32> to vector<16x16xf32>
    %39 = arith.subf %35, %38 : vector<16x16xf32>
    %40 = math.exp %39 : vector<16x16xf32>
    %cst_9 = arith.constant dense<0.000000e+00> : vector<16xf32>
    %41 = vector.multi_reduction <add>, %40, %cst_9 [1] : vector<16x16xf32> to vector<16xf32>
    %42 = vector.shape_cast %41 : vector<16xf32> to vector<16x1xf32>
    %43 = tpu.reciprocal %42 {approx = true} : vector<16x1xf32> -> vector<16x1xf32>
    %44 = vector.broadcast %43 : vector<16x1xf32> to vector<16x16xf32>
    %45 = arith.mulf %40, %44 : vector<16x16xf32>
    %46 = arith.truncf %45 : vector<16x16xf32> to vector<16x16xbf16>
    %cst_10 = arith.constant dense<0.000000e+00> : vector<16x32xf32>
    %47 = tpu.matmul %46, %21, %cst_10 {dimension_numbers = #tpu.dot_dimension_numbers<[1], [0], [0], [1], [0, 0, 1, 1], [], []>} : vector<16x16xbf16>, vector<16x32xbf16>, vector<16x32xf32> -> vector<16x32xf32>
    %c0_11 = arith.constant 0 : index
    %c384 = arith.constant 384 : index
    %48 = vector.load %arg1[%c0_11, %c384] : memref<64x960xf32, #tpu.memory_space<vmem>>, vector<32x32xf32>
    %49 = arith.truncf %48 : vector<32x32xf32> to vector<32x32xbf16>
    %50 = arith.truncf %47 : vector<16x32xf32> to vector<16x32xbf16>
    %cst_12 = arith.constant dense<0.000000e+00> : vector<16x32xf32>
    %51 = tpu.matmul %50, %49, %cst_12 {dimension_numbers = #tpu.dot_dimension_numbers<[1], [0], [0], [1], [0, 0, 1, 1], [], []>} : vector<16x32xbf16>, vector<32x32xbf16>, vector<16x32xf32> -> vector<16x32xf32>
    %c1_13 = arith.constant 1 : index
    %c768_14 = arith.constant 768 : index
    %52 = vector.load %arg1[%c1_13, %c768_14] : memref<64x960xf32, #tpu.memory_space<vmem>>, vector<1x32xf32>
    %53 = vector.broadcast %52 : vector<1x32xf32> to vector<16x32xf32>
    %54 = arith.addf %51, %53 : vector<16x32xf32>
    %55 = arith.addf %19, %54 : vector<16x32xf32>
    %c2 = arith.constant 2 : index
    %c768_15 = arith.constant 768 : index
    %56 = vector.load %arg1[%c2, %c768_15] : memref<64x960xf32, #tpu.memory_space<vmem>>, vector<1x32xf32>
    %c3 = arith.constant 3 : index
    %c768_16 = arith.constant 768 : index
    %57 = vector.load %arg1[%c3, %c768_16] : memref<64x960xf32, #tpu.memory_space<vmem>>, vector<1x32xf32>
    %cst_17 = arith.constant dense<0.000000e+00> : vector<16xf32>
    %58 = vector.multi_reduction <add>, %55, %cst_17 [1] : vector<16x32xf32> to vector<16xf32>
    %59 = vector.shape_cast %58 : vector<16xf32> to vector<16x1xf32>
    %cst_18 = arith.constant 3.200000e+01 : f32
    %60 = vector.broadcast %cst_18 : f32 to vector<16x1xf32>
    %61 = arith.divf %59, %60 : vector<16x1xf32>
    %62 = vector.broadcast %61 : vector<16x1xf32> to vector<16x32xf32>
    %63 = arith.subf %55, %62 : vector<16x32xf32>
    %64 = arith.mulf %63, %63 : vector<16x32xf32>
    %cst_19 = arith.constant dense<0.000000e+00> : vector<16xf32>
    %65 = vector.multi_reduction <add>, %64, %cst_19 [1] : vector<16x32xf32> to vector<16xf32>
    %66 = vector.shape_cast %65 : vector<16xf32> to vector<16x1xf32>
    %cst_20 = arith.constant 3.200000e+01 : f32
    %67 = vector.broadcast %cst_20 : f32 to vector<16x1xf32>
    %68 = arith.divf %66, %67 : vector<16x1xf32>
    %69 = vector.broadcast %61 : vector<16x1xf32> to vector<16x32xf32>
    %70 = arith.subf %55, %69 : vector<16x32xf32>
    %cst_21 = arith.constant 9.99999974E-6 : f32
    %71 = vector.broadcast %cst_21 : f32 to vector<16x1xf32>
    %72 = arith.addf %68, %71 : vector<16x1xf32>
    %73 = math.rsqrt %72 : vector<16x1xf32>
    %74 = vector.broadcast %73 : vector<16x1xf32> to vector<16x32xf32>
    %75 = arith.mulf %70, %74 : vector<16x32xf32>
    %76 = vector.broadcast %56 : vector<1x32xf32> to vector<16x32xf32>
    %77 = arith.mulf %75, %76 : vector<16x32xf32>
    %78 = vector.broadcast %57 : vector<1x32xf32> to vector<16x32xf32>
    %79 = arith.addf %77, %78 : vector<16x32xf32>
    %c0_22 = arith.constant 0 : index
    %c512 = arith.constant 512 : index
    %80 = vector.load %arg1[%c0_22, %c512] : memref<64x960xf32, #tpu.memory_space<vmem>>, vector<32x64xf32>
    %81 = arith.truncf %80 : vector<32x64xf32> to vector<32x64xbf16>
    %82 = arith.truncf %79 : vector<16x32xf32> to vector<16x32xbf16>
    %cst_23 = arith.constant dense<0.000000e+00> : vector<16x64xf32>
    %83 = tpu.matmul %82, %81, %cst_23 {dimension_numbers = #tpu.dot_dimension_numbers<[1], [0], [0], [1], [0, 0, 1, 1], [], []>} : vector<16x32xbf16>, vector<32x64xbf16>, vector<16x64xf32> -> vector<16x64xf32>
    %c4 = arith.constant 4 : index
    %c768_24 = arith.constant 768 : index
    %84 = vector.load %arg1[%c4, %c768_24] : memref<64x960xf32, #tpu.memory_space<vmem>>, vector<1x64xf32>
    %85 = vector.broadcast %84 : vector<1x64xf32> to vector<16x64xf32>
    %86 = arith.addf %83, %85 : vector<16x64xf32>
    %cst_25 = arith.constant 0.000000e+00 : f32
    %87 = vector.broadcast %cst_25 : f32 to vector<16x64xf32>
    %88 = arith.maximumf %86, %87 : vector<16x64xf32>
    %c0_26 = arith.constant 0 : index
    %c256 = arith.constant 256 : index
    %89 = vector.load %arg1[%c0_26, %c256] : memref<64x960xf32, #tpu.memory_space<vmem>>, vector<64x32xf32>
    %90 = arith.truncf %89 : vector<64x32xf32> to vector<64x32xbf16>
    %91 = arith.truncf %88 : vector<16x64xf32> to vector<16x64xbf16>
    %cst_27 = arith.constant dense<0.000000e+00> : vector<16x32xf32>
    %92 = tpu.matmul %91, %90, %cst_27 {dimension_numbers = #tpu.dot_dimension_numbers<[1], [0], [0], [1], [0, 0, 1, 1], [], []>} : vector<16x64xbf16>, vector<64x32xbf16>, vector<16x32xf32> -> vector<16x32xf32>
    %c5 = arith.constant 5 : index
    %c768_28 = arith.constant 768 : index
    %93 = vector.load %arg1[%c5, %c768_28] : memref<64x960xf32, #tpu.memory_space<vmem>>, vector<1x32xf32>
    %94 = vector.broadcast %93 : vector<1x32xf32> to vector<16x32xf32>
    %95 = arith.addf %92, %94 : vector<16x32xf32>
    %96 = arith.addf %79, %95 : vector<16x32xf32>
    %c6 = arith.constant 6 : index
    %c768_29 = arith.constant 768 : index
    %97 = vector.load %arg1[%c6, %c768_29] : memref<64x960xf32, #tpu.memory_space<vmem>>, vector<1x32xf32>
    %c7 = arith.constant 7 : index
    %c768_30 = arith.constant 768 : index
    %98 = vector.load %arg1[%c7, %c768_30] : memref<64x960xf32, #tpu.memory_space<vmem>>, vector<1x32xf32>
    %cst_31 = arith.constant dense<0.000000e+00> : vector<16xf32>
    %99 = vector.multi_reduction <add>, %96, %cst_31 [1] : vector<16x32xf32> to vector<16xf32>
    %100 = vector.shape_cast %99 : vector<16xf32> to vector<16x1xf32>
    %cst_32 = arith.constant 3.200000e+01 : f32
    %101 = vector.broadcast %cst_32 : f32 to vector<16x1xf32>
    %102 = arith.divf %100, %101 : vector<16x1xf32>
    %103 = vector.broadcast %102 : vector<16x1xf32> to vector<16x32xf32>
    %104 = arith.subf %96, %103 : vector<16x32xf32>
    %105 = arith.mulf %104, %104 : vector<16x32xf32>
    %cst_33 = arith.constant dense<0.000000e+00> : vector<16xf32>
    %106 = vector.multi_reduction <add>, %105, %cst_33 [1] : vector<16x32xf32> to vector<16xf32>
    %107 = vector.shape_cast %106 : vector<16xf32> to vector<16x1xf32>
    %cst_34 = arith.constant 3.200000e+01 : f32
    %108 = vector.broadcast %cst_34 : f32 to vector<16x1xf32>
    %109 = arith.divf %107, %108 : vector<16x1xf32>
    %110 = vector.broadcast %102 : vector<16x1xf32> to vector<16x32xf32>
    %111 = arith.subf %96, %110 : vector<16x32xf32>
    %cst_35 = arith.constant 9.99999974E-6 : f32
    %112 = vector.broadcast %cst_35 : f32 to vector<16x1xf32>
    %113 = arith.addf %109, %112 : vector<16x1xf32>
    %114 = math.rsqrt %113 : vector<16x1xf32>
    %115 = vector.broadcast %114 : vector<16x1xf32> to vector<16x32xf32>
    %116 = arith.mulf %111, %115 : vector<16x32xf32>
    %117 = vector.broadcast %97 : vector<1x32xf32> to vector<16x32xf32>
    %118 = arith.mulf %116, %117 : vector<16x32xf32>
    %119 = vector.broadcast %98 : vector<1x32xf32> to vector<16x32xf32>
    %120 = arith.addf %118, %119 : vector<16x32xf32>
    %c0_36 = arith.constant 0 : index
    %c640 = arith.constant 640 : index
    %121 = vector.load %arg1[%c0_36, %c640] : memref<64x960xf32, #tpu.memory_space<vmem>>, vector<32x16xf32>
    %122 = arith.truncf %121 : vector<32x16xf32> to vector<32x16xbf16>
    %123 = arith.truncf %120 : vector<16x32xf32> to vector<16x32xbf16>
    %cst_37 = arith.constant dense<0.000000e+00> : vector<16x16xf32>
    %124 = tpu.matmul %123, %122, %cst_37 {dimension_numbers = #tpu.dot_dimension_numbers<[1], [0], [0], [1], [0, 0, 1, 1], [], []>} : vector<16x32xbf16>, vector<32x16xbf16>, vector<16x16xf32> -> vector<16x16xf32>
    %c8 = arith.constant 8 : index
    %c768_38 = arith.constant 768 : index
    %125 = vector.load %arg1[%c8, %c768_38] : memref<64x960xf32, #tpu.memory_space<vmem>>, vector<1x16xf32>
    %126 = vector.broadcast %125 : vector<1x16xf32> to vector<16x16xf32>
    %127 = arith.addf %124, %126 : vector<16x16xf32>
    %c0_39 = arith.constant 0 : index
    %c0_40 = arith.constant 0 : index
    %128 = vector.load %arg2[%c0_39, %c0_40] : memref<16x16xf32, #tpu.memory_space<vmem>>, vector<16x16xf32>
    tpu.vector_store %arg2[%c0_39, %c0_40], %127 {strides = array<i32>} : memref<16x16xf32, #tpu.memory_space<vmem>>, vector<16x16xf32>,
    return
  }
}

</mosaic_0001>

<bundles_post_ra>
// kernel: note_events_forward.1
= control target key start
LH: loop header
LB: loop body
LE: loop exit
PB: predicated region body
PF: predicated region fallthrough
CT: control target
= control target key end

     0   :  { %7 = vsyncpa [#allocation3], 0  ;;  %s845_s0 = inlined_call_operand.vmem [shape: s32[16,2], index: 0, kind: input, shape index: {}]   ;;  %s846_s1 = inlined_call_operand.hbm [shape: f32[64,960], index: 1, kind: input, shape index: {}]   ;;  %s847_s2 = inlined_call_operand.hbm [shape: f32[16,16], index: 2, kind: output, shape index: {}]  }
   0x1   :  { %8 = vsyncpa [#allocation4], 0  ;;  %s731_s9 = smov [#allocation2]   ;;  %s683_s13 = scalar_lea.hbm %s846_s1, 8192 }
   0x2   :  { %s16_s10 = sshll.u32 %s731_s9, 4  ;;  %p684_p0 = scmp.ne.s32.totalorder %s846_s1, %s683_s13  ;;  %s17_s10 = int_to_ptr.vmem [resolvable:$true] %s16_s10 }
   0x3   :  { %p687_p1 = scmp.lt.u32.totalorder %s683_s13, %s846_s1 }
   0x5   :  { %p689_p2 = pnand %p687_p1, %p684_p0 }
   0x7   :  { %692 = shalt.err (!%p689_p2)
}
   0x8   :  { %s693_s18 = scalar_lea.vmem %s17_s10, 8192  ;;  %p698_p4 = scmp.lt.s32.totalorder %s17_s10, %s17_s10 }
   0x9   :  { %p694_p3 = scmp.ne.s32.totalorder %s17_s10, %s693_s18  ;;  %p699_p5 = scmp.lt.s32.totalorder %s693_s18, %s693_s18 }
   0xb   :  { %p700_p6 = por %p699_p5, %p698_p4 }
   0xd   :  { %p701_p7 = pnand %p700_p6, %p694_p3 }
   0xf   :  { %704 = shalt.err (!%p701_p7)
}
  0x10   :  { %s732_s19 = smov 1024   ;;  %s733_s20 = smov 64  }
  0x11   :  { %22 = dma.hbm_to_vmem [thread:$0]  %s846_s1, 8192, %s17_s10, [#allocation3], %s732_s19, %s732_s19, %s733_s20  }
  0x12   :  { %727 = dma.done.wait [#allocation3], 8192  }
  0x13   :  { %728 = vsyncadd [#allocation3], 4294959104  ;;  %v734_v0 = vmov 0   ;;  %v735_v1 = vmov 1   ;;  %v27_v2 = vld [vmem:[%s845_s0] sm:$0xff]  ;;  %v28_v3 = vld [vmem:[%s845_s0 + $0x8] sm:$0xff]  ;;  %v29_v31 = vlaneseq }
  0x14   :  { %664 = vset.pattern.permute.xlu0 %v734_v0  ;;  %665 = vset.pattern.permute.xlu1 %v735_v1  ;;  %v57_v4 = vld [vmem:[#allocation2 + $0x8] sm:$0xff]  ;;  %v39_v5 = vadd.s32 32, %v27_v2  ;;  %v56_v7 = vld [vmem:[#allocation2] sm:$0xff]  ;;  %v736_v14 = vmov 0.0   ;;  %v40_v15 = vadd.s32 32, %v28_v3  ;;  %vm93_vm6 = vcmask 523264  }
  0x15   :  { %129 = vmatprep.mubr.bf16.mxu0 %v734_v0  ;;  %32 = vperm.xlu0 %664, %v27_v2   ;;  %v59_v6 = vld [vmem:[#allocation2 + $0x48] sm:$0xff]  ;;  %v58_v8 = vld [vmem:[#allocation2 + $0x40] sm:$0xff]  ;;  %v30_v32 = vand.u32 127, %v29_v31  ;;  %vm737_vm7 = vmmov 0   ;;  %v84_v40 = vshrl.u32 %v29_v31, 7  ;;  %vm202_vm9 = vcmask 130048  }
  0x16   :  { %v73_v9 = vpack.c.bf16 %v59_v6, %v57_v4  ;;  %v72_v10 = vpack.c.bf16 %v58_v8, %v56_v7  ;;  %v61_v11 = vld [vmem:[#allocation2 + $0x88] sm:$0xff]  ;;  %v60_v13 = vld [vmem:[#allocation2 + $0x80] sm:$0xff]  ;;  %605 = vmatprep.subr.bf16.mxu1 %v736_v14  ;;  %42 = vperm.xlu1 %665, %v39_v5   ;;  %v81_v42 = vld [vmem:[#allocation2 + $0x30] ss:$8 sm:$0x3]  ;;  %s738_s0 = smov 96  }
  0x17   :  { %v63_v12 = vld [vmem:[#allocation2 + $0xc8] sm:$0xff]  ;;  %v62_v17 = vld [vmem:[#allocation2 + $0xc0] sm:$0xff]  ;;  %607 = vmatprep.mubr.msk.bf16.mxu1 %vm737_vm7, %v736_v14  ;;  %v85_v41 = vsub.s32 0, %v84_v40  ;;  %v89_v43 = vsub.s32 1, %v84_v40  ;;  %v194_v58 = vadd.s32 8, %v84_v40  ;;  %v195_v59 = vand.u32 1, %v84_v40 }
  0x18   :  { %v75_v16 = vpack.c.bf16 %v63_v12, %v61_v11  ;;  %v65_v18 = vld [vmem:[#allocation2 + $0x108] sm:$0xff]  ;;  %97 = vmatprep.subr.bf16.mxu0 %v73_v9  ;;  %v74_v20 = vpack.c.bf16 %v62_v17, %v60_v13  ;;  %v64_v22 = vld [vmem:[#allocation2 + $0x100] sm:$0xff]  ;;  %v197_v60 = vand.u32 1, %v30_v32  ;;  %v273_v17 = vld [vmem:[#allocation2 + $0x18] sm:$0xff]  ;;  %vm281_vm11 = vcmask 261120   ;;  %s739_s1 = smov [#allocation5]  }
  0x19   :  { %v67_v19 = vld [vmem:[#allocation2 + $0x148] sm:$0xff]  ;;  %35 = vperm.xlu0 %664, %v28_v3   ;;  %98 = vmatpush1.bf16.msra.mxu0 %v72_v10  ;;  %v66_v23 = vld [vmem:[#allocation2 + $0x140] sm:$0xff]  ;;  %v86_v44 = vrot.slane %v81_v42, %v85_v41  ;;  %v90_v46 = vrot.slane %v81_v42, %v89_v43  ;;  %v196_v61 = vand.u32 1, %v194_v58  ;;  %s566_s27 = sshll.u32 %s739_s1, 4  ;;  %s567_s27 = int_to_ptr.vmem [resolvable:$true] %s566_s27 }
  0x1a   :  { %99 = vmatprep.subr.bf16.mxu0 %v75_v16  ;;  %v77_v21 = vpack.c.bf16 %v67_v19, %v65_v18  ;;  %45 = vperm.xlu1 %665, %v40_v15   ;;  %v69_v24 = vld [vmem:[#allocation2 + $0x188] sm:$0xff]  ;;  %v76_v26 = vpack.c.bf16 %v66_v23, %v64_v22  ;;  %v68_v28 = vld [vmem:[#allocation2 + $0x180] sm:$0xff]  ;;  %vm198_vm8 = vcmp.eq.s32.totalorder %v195_v59, %v197_v60  ;;  %v274_v18 = vld [vmem:[#allocation2 + $0x58] sm:$0xff]  ;;  %s705_s28 = scalar_lea.vmem %s567_s27, 256  ;;  %p710_p9 = scmp.lt.s32.totalorder %s567_s27, %s567_s27 }
  0x1b   :  { %v71_v25 = vld [vmem:[#allocation2 + $0x1c8] sm:$0xff]  ;;  %v70_v29 = vld [vmem:[#allocation2 + $0x1c0] sm:$0xff]  ;;  %vm199_vm10 = vcmp.eq.s32.totalorder %v196_v61, %v197_v60  ;;  %v277_v19 = vpack.c.bf16 %v274_v18, %v273_v17  ;;  %v329_v18 = vld [vmem:[#allocation2 + $0x33] ss:$0 sm:$0xff]  ;;  %p706_p8 = scmp.ne.s32.totalorder %s567_s27, %s705_s28  ;;  %p711_p10 = scmp.lt.s32.totalorder %s705_s28, %s705_s28 }
  0x1c   :  { %v79_v27 = vpack.c.bf16 %v71_v25, %v69_v24  ;;  %v78_v30 = vpack.c.bf16 %v70_v29, %v68_v28  ;;  %v275_v28 = vld [vmem:[#allocation2 + $0x98] sm:$0xff]  ;;  %v361_v58 = vld [vmem:[#allocation2 + $0x20] sm:$0xff] }
  0x1d   :  { %100 = vmatpush1.bf16.msra.mxu0 %v74_v20  ;;  %666 = vset.pattern.permute.xlu0 %v735_v1  ;;  %v276_v29 = vld [vmem:[#allocation2 + $0xd8] sm:$0xff]  ;;  %v363_v60 = vld [vmem:[#allocation2 + $0xa0] sm:$0xff]  ;;  %p712_p11 = por %p711_p10, %p710_p9 }
  0x1e   :  { %101 = vmatprep.subr.bf16.mxu0 %v77_v21  ;;  %v364_v61 = vld [vmem:[#allocation2 + $0xe0] sm:$0xff] }
  0x1f   :  { %p713_p12 = pnand %p712_p11, %p706_p8 }
  0x21   :  { %102 = vmatpush1.bf16.msra.mxu0 %v76_v26 }
  0x22   :  { %103 = vmatprep.subr.bf16.mxu0 %v79_v27 }
  0x25   :  { %104 = vmatpush1.bf16.msra.mxu0 %v78_v30  ;;  %v278_v30 = vpack.c.bf16 %v276_v29, %v275_v28  ;;  %v368_v29 = vld [vmem:[#allocation2 + $0x34] ss:$0 sm:$0xff] }
  0x26   :  { %617 = vmatprep.subr.bf16.mxu0 %v736_v14 }
  0x94   :  { %v33_v33 = vpop.permute.xlu0 %32 }
  0x95   :  { %v43_v34 = vpop.permute.xlu1 %42  ;;  %vm37_vm0 = vcmp.eq.s32.totalorder %v30_v32, %v33_v33 }
  0x96   :  { %vm47_vm1 = vcmp.eq.s32.totalorder %v30_v32, %v43_v34 }
  0x97   :  { %vm49_vm2 = vmor %vm37_vm0, %vm47_vm1 }
  0x98   :  { %v36_v35 = vpop.permute.xlu0 %35  ;;  %v578_v37 = vsel %vm49_vm2, 1.0, %v736_v14 }
  0x99   :  { %v46_v36 = vpop.permute.xlu1 %45  ;;  %vm38_vm3 = vcmp.eq.s32.totalorder %v30_v32, %v36_v35 }
  0x9a   :  { %vm48_vm4 = vcmp.eq.s32.totalorder %v30_v32, %v46_v36  ;;  %v280_v36 = vld [vmem:[#allocation2 + $0x31] ss:$0 sm:$0xff] }
  0x9b   :  { %vm50_vm5 = vmor %vm38_vm3, %vm48_vm4 }
  0x9c   :  { %v579_v38 = vsel %vm50_vm5, 1.0, %v736_v14 }
  0x9d   :  { %v55_v39 = vpack.c.bf16 %v579_v38, %v578_v37 }
  0x9f   :  { %580 = vmatmul.mubr.msk.bf16.vlgmr.msra.gmra.mrb[0].mxu0 %vm93_vm6, %v55_v39 }
  0xa0   :  { %621 = vmatprep.mubr.msk.bf16.mxu0 %vm737_vm7, %v736_v14  ;;  %618 = vmatpush3.bf16.msra.mxu0 %v277_v19 }
  0xa1   :  { %619 = vmatprep.subr.bf16.mxu0 %v736_v14 }
  0xa4   :  { %620 = vmatpush3.bf16.msra.mxu0 %v278_v30 }
  0xa5   :  { %633 = vmatprep.subr.bf16.mxu0 %v736_v14 }
 0x172   :  { %v131_v45 = vpop.f32.mrb[0].mxu0 }
 0x173   :  { %v133_v47 = vpop.f32.mrb[1].mxu0  ;;  %v785_v49 = vadd.f32 %v131_v45, %v86_v44 }
 0x174   :  { %v135_v48 = vpop.f32.mrb[2].mxu0  ;;  %v134_v52 = vadd.f32 %v133_v47, %v90_v46 }
 0x175   :  { %v787_v50 = vadd.f32 %v135_v48, %v86_v44  ;;  %v137_v51 = vpop.f32.mrb[3].mxu0 }
 0x176   :  { %v138_v53 = vadd.f32 %v137_v51, %v90_v46 }
 0x177   :  { %v140_v54 = vpack.c.bf16 %v787_v50, %v785_v49 }
 0x178   :  { %v141_v55 = vpack.c.bf16 %v138_v53, %v134_v52 }
 0x179   :  { %143 = vrot.lane.b32.xlu0 %v140_v54, %s733_s20 }
 0x17a   :  { %v149_v56 = vsel %vm93_vm6, %v141_v55, 0 }
 0x17b   :  { %606 = vmatpush3.bf16.xpose.msra.mxu1 %v149_v56 }
 0x17c   :  { %611 = vmatprep.subr.bf16.mxu1 %v736_v14 }
 0x1eb   :  { %v144_v57 = vpop.permute.xlu0 %143 }
 0x1ec   :  { %608 = vmatmul.mubr.msk.bf16.vlgmr.msra.gmra.mrb[0].mxu1 %vm93_vm6, %v144_v57 }
 0x1ed   :  { %613 = vmatprep.mubr.msk.bf16.mxu1 %vm737_vm7, %v736_v14 }
 0x2bf   :  { %v185_v62 = vpop.f32.mrb[0].mxu1 }
 0x2c0   :  { %v200_v63 = vsel %vm198_vm8, %v185_v62, -1e+30  ;;  %v609_v0 = vpop.f32.mrb[1].mxu1  ;;  %v366_v62 = vpack.c.bf16 %v364_v61, %v363_v60  ;;  %v507_v60 = vld [vmem:[#allocation2 + $0x28] sm:$0xff] }
 0x2c1   :  { %v188_v1 = vpop.f32.mrb[2].mxu1  ;;  %v203_v2 = vsel %vm202_vm9, %v200_v63, -inf  ;;  %v416_v0 = vld [vmem:[#allocation2 + $0x50] sm:$0xff]  ;;  %v508_v61 = vld [vmem:[#allocation2 + $0x68] sm:$0xff] }
 0x2c2   :  { %v201_v3 = vsel %vm199_vm10, %v188_v1, -1e+30  ;;  %204 = vmax.xlane.f32.xlu1 %v203_v2  ;;  %v610_v4 = vpop.f32.mrb[3].mxu1  ;;  %v417_v1 = vld [vmem:[#allocation2 + $0x90] sm:$0xff] }
 0x2c3   :  { %v206_v5 = vsel %vm202_vm9, %v201_v3, -inf }
 0x2c4   :  { %207 = vmax.xlane.f32.xlu0 %v206_v5 }
 0x34f   :  { %v205_v6 = vpop.xlane.xlu1 %204 }
 0x350   :  { %v209_v7 = vsub.f32 %v200_v63, %v205_v6  ;;  %v415_v63 = vld [vmem:[#allocation2 + $0x10] sm:$0xff] }
 0x351   :  { %v208_v8 = vpop.xlane.xlu0 %207  ;;  %v423_v2 = vpack.c.bf16 %v416_v0, %v415_v63  ;;  %v509_v63 = vld [vmem:[#allocation2 + $0xa8] sm:$0xff] }
 0x352   :  { %v211_v9 = vmul.f32 1.442695, %v209_v7  ;;  %v210_v10 = vsub.f32 %v201_v3, %v208_v8  ;;  %v418_v3 = vld [vmem:[#allocation2 + $0xd0] sm:$0xff]  ;;  %v510_v0 = vld [vmem:[#allocation2 + $0xe8] sm:$0xff] }
 0x353   :  { %v424_v4 = vpack.c.bf16 %v418_v3, %v417_v1  ;;  %v512_v1 = vpack.c.bf16 %v510_v0, %v509_v63 }
 0x354   :  { %667 = vpow2.f32 %v211_v9  ;;  %v213_v11 = vmul.f32 1.442695, %v210_v10 }
 0x356   :  { %669 = vpow2.f32 %v213_v11 }
 0x35e   :  { %v668_v12 = vpop.eup %667 }
 0x35f   :  { %v215_v13 = vsel %vm202_vm9, %v668_v12, 0.0 }
 0x360   :  { %v670_v15 = vpop.eup %669  ;;  %216 = vadd.xlane.f32.xlu0 %v215_v13  ;;  %v328_v13 = vld [vmem:[#allocation2 + $0x32] ss:$0 sm:$0xff] }
 0x361   :  { %v218_v16 = vsel %vm202_vm9, %v670_v15, 0.0 }
 0x362   :  { %219 = vadd.xlane.f32.xlu1 %v218_v16 }
 0x376   :  { %226 = vrot.lane.b32.xlu0 %v140_v54, %s738_s0 }
 0x3ed   :  { %v217_v20 = vpop.xlane.xlu0 %216 }
 0x3ee   :  { %671 = vrcp.f32 %v217_v20 }
 0x3ef   :  { %v220_v21 = vpop.xlane.xlu1 %219 }
 0x3f0   :  { %673 = vrcp.f32 %v220_v21 }
 0x3f1   :  { %v227_v22 = vpop.permute.xlu0 %226 }
 0x3f2   :  { %612 = vmatpush3.bf16.msra.mxu1 %v227_v22 }
 0x3f3   :  { %625 = vmatprep.subr.bf16.mxu1 %v736_v14 }
 0x3f8   :  { %v672_v23 = vpop.eup %671 }
 0x3f9   :  { %v223_v25 = vmul.f32 %v672_v23, %v668_v12  ;;  %v419_v23 = vld [vmem:[#allocation2 + $0x110] sm:$0xff] }
 0x3fa   :  { %v674_v24 = vpop.eup %673 }
 0x3fb   :  { %v224_v26 = vmul.f32 %v674_v24, %v670_v15  ;;  %v420_v24 = vld [vmem:[#allocation2 + $0x150] sm:$0xff] }
 0x3fd   :  { %v225_v27 = vpack.c.bf16 %v224_v26, %v223_v25  ;;  %v425_v25 = vpack.c.bf16 %v420_v24, %v419_v23  ;;  %v421_v26 = vld [vmem:[#allocation2 + $0x190] sm:$0xff] }
 0x3ff   :  { %614 = vmatmul.mubr.msk.bf16.vlgmr.msra.gmra.mrb[4].mxu1 %vm202_vm9, %v225_v27  ;;  %v422_v27 = vld [vmem:[#allocation2 + $0x1d0] sm:$0xff] }
 0x400   :  { %629 = vmatprep.mubr.msk.bf16.mxu1 %vm737_vm7, %v736_v14  ;;  %v426_v28 = vpack.c.bf16 %v422_v27, %v421_v26 }
 0x4d2   :  { %v266_v31 = vpop.f32.mrb[4].mxu1 }
 0x4d3   :  { %v615_v32 = vpop.f32.mrb[5].mxu1 }
 0x4d4   :  { %v269_v33 = vpop.f32.mrb[6].mxu1 }
 0x4d5   :  { %v279_v34 = vpack.c.bf16 %v269_v33, %v266_v31  ;;  %v616_v35 = vpop.f32.mrb[7].mxu1 }
 0x4d7   :  { %622 = vmatmul.mubr.msk.bf16.vlgmr.msra.gmra.mrb[4].mxu0 %vm281_vm11, %v279_v34 }
 0x4d8   :  { %641 = vmatprep.mubr.msk.bf16.mxu0 %vm737_vm7, %v736_v14  ;;  %634 = vmatpush3.bf16.msra.mxu0 %v423_v2 }
 0x4d9   :  { %635 = vmatprep.subr.bf16.mxu0 %v736_v14 }
 0x4dc   :  { %636 = vmatpush3.bf16.msra.mxu0 %v424_v4 }
 0x4dd   :  { %637 = vmatprep.subr.bf16.mxu0 %v736_v14 }
 0x4e0   :  { %638 = vmatpush3.bf16.msra.mxu0 %v425_v25 }
 0x4e1   :  { %639 = vmatprep.subr.bf16.mxu0 %v736_v14 }
 0x4e4   :  { %640 = vmatpush3.bf16.msra.mxu0 %v426_v28 }
 0x5aa   :  { %v319_v37 = vpop.f32.mrb[4].mxu0 }
 0x5ab   :  { %v320_v38 = vadd.f32 %v319_v37, %v280_v36  ;;  %v623_v39 = vpop.f32.mrb[5].mxu0 }
 0x5ac   :  { %v322_v40 = vpop.f32.mrb[6].mxu0  ;;  %v428_v39 = vld [vmem:[#allocation2 + $0x35] ss:$0 sm:$0xff] }
 0x5ad   :  { %v323_v41 = vadd.f32 %v322_v40, %v280_v36  ;;  %v624_v42 = vpop.f32.mrb[7].mxu0  ;;  %v326_v43 = vadd.f32 %v320_v38, %v785_v49 }
 0x5af   :  { %v330_v44 = vsel %vm281_vm11, %v326_v43, 0.0  ;;  %v327_v45 = vadd.f32 %v323_v41, %v787_v50  ;;  %v362_v50 = vld [vmem:[#allocation2 + $0x60] sm:$0xff] }
 0x5b0   :  { %331 = vadd.xlane.f32.xlu1 %v330_v44  ;;  %v365_v59 = vpack.c.bf16 %v362_v50, %v361_v58 }
 0x5b1   :  { %v333_v46 = vsel %vm281_vm11, %v327_v45, 0.0 }
 0x5b2   :  { %626 = vmatpush3.bf16.msra.mxu1 %v365_v59 }
 0x5b3   :  { %627 = vmatprep.subr.bf16.mxu1 %v736_v14 }
 0x5b4   :  { %334 = vadd.xlane.f32.xlu1 %v333_v46 }
 0x5b6   :  { %628 = vmatpush3.bf16.msra.mxu1 %v366_v62  ;;  %v511_v62 = vpack.c.bf16 %v508_v61, %v507_v60 }
 0x5b7   :  { %645 = vmatprep.subr.bf16.mxu1 %v736_v14 }
 0x63d   :  { %v332_v47 = vpop.xlane.xlu1 %331 }
 0x63e   :  { %v337_v48 = vmul.f32 0.03125, %v332_v47 }
 0x640   :  { %v339_v51 = vsub.f32 %v326_v43, %v337_v48 }
 0x641   :  { %v335_v52 = vpop.xlane.xlu1 %334 }
 0x642   :  { %v338_v53 = vmul.f32 0.03125, %v335_v52  ;;  %v341_v54 = vmul.f32 %v339_v51, %v339_v51 }
 0x644   :  { %v340_v55 = vsub.f32 %v327_v45, %v338_v53  ;;  %v343_v56 = vsel %vm281_vm11, %v341_v54, 0.0 }
 0x645   :  { %344 = vadd.xlane.f32.xlu1 %v343_v56 }
 0x646   :  { %v342_v57 = vmul.f32 %v340_v55, %v340_v55 }
 0x648   :  { %v346_v49 = vsel %vm281_vm11, %v342_v57, 0.0 }
 0x649   :  { %347 = vadd.xlane.f32.xlu1 %v346_v49 }
 0x6d2   :  { %v345_v5 = vpop.xlane.xlu1 %344 }
 0x6d3   :  { %v349_v6 = vmul.f32 0.03125, %v345_v5 }
 0x6d5   :  { %v351_v7 = vadd.f32 1e-05, %v349_v6 }
 0x6d6   :  { %v348_v8 = vpop.xlane.xlu1 %347 }
 0x6d7   :  { %675 = vrsqrt.f32 %v351_v7  ;;  %v350_v9 = vmul.f32 0.03125, %v348_v8 }
 0x6d9   :  { %v352_v10 = vadd.f32 1e-05, %v350_v9 }
 0x6db   :  { %677 = vrsqrt.f32 %v352_v10  ;;  %v475_v10 = vld [vmem:[#allocation2 + $0x36] ss:$0 sm:$0xff] }
 0x6e1   :  { %v676_v11 = vpop.eup %675 }
 0x6e2   :  { %v355_v12 = vmul.f32 %v676_v11, %v339_v51 }
 0x6e4   :  { %v357_v16 = vmul.f32 %v355_v12, %v328_v13 }
 0x6e5   :  { %v678_v15 = vpop.eup %677 }
 0x6e6   :  { %v356_v17 = vmul.f32 %v678_v15, %v340_v55  ;;  %v359_v20 = vadd.f32 %v357_v16, %v329_v18  ;;  %v476_v15 = vld [vmem:[#allocation2 + $0x37] ss:$0 sm:$0xff] }
 0x6e8   :  { %v358_v19 = vmul.f32 %v356_v17, %v328_v13 }
 0x6ea   :  { %v360_v21 = vadd.f32 %v358_v19, %v329_v18  ;;  %v514_v19 = vld [vmem:[#allocation2 + $0x70] ss:$0 sm:$0xff] }
 0x6ec   :  { %v367_v22 = vpack.c.bf16 %v360_v21, %v359_v20 }
 0x6ee   :  { %630 = vmatmul.mubr.msk.bf16.vlgmr.msra.gmra.mrb[8].mxu1 %vm281_vm11, %v367_v22 }
 0x6ef   :  { %649 = vmatprep.mubr.msk.bf16.mxu1 %vm737_vm7, %v736_v14  ;;  %646 = vmatpush3.bf16.msra.mxu1 %v511_v62 }
 0x6f0   :  { %647 = vmatprep.subr.bf16.mxu1 %v736_v14 }
 0x6f3   :  { %648 = vmatpush3.bf16.msra.mxu1 %v512_v1 }
 0x7c1   :  { %v406_v30 = vpop.f32.mrb[8].mxu1 }
 0x7c2   :  { %v407_v31 = vadd.f32 %v406_v30, %v368_v29  ;;  %v631_v32 = vpop.f32.mrb[9].mxu1 }
 0x7c3   :  { %v409_v33 = vpop.f32.mrb[10].mxu1 }
 0x7c4   :  { %v410_v34 = vadd.f32 %v409_v33, %v368_v29  ;;  %v632_v35 = vpop.f32.mrb[11].mxu1  ;;  %v413_v36 = vmax.f32 %v407_v31, 0.0 }
 0x7c6   :  { %v414_v37 = vmax.f32 %v410_v34, 0.0 }
 0x7c8   :  { %v427_v38 = vpack.c.bf16 %v414_v37, %v413_v36 }
 0x7ca   :  { %642 = vmatmul.mubr.msk.bf16.vlgmr.msra.gmra.mrb[8].mxu0 %vm93_vm6, %v427_v38 }
 0x89d   :  { %v466_v40 = vpop.f32.mrb[8].mxu0 }
 0x89e   :  { %v467_v41 = vadd.f32 %v466_v40, %v428_v39  ;;  %v643_v42 = vpop.f32.mrb[9].mxu0 }
 0x89f   :  { %v469_v43 = vpop.f32.mrb[10].mxu0 }
 0x8a0   :  { %v470_v44 = vadd.f32 %v469_v43, %v428_v39  ;;  %v644_v45 = vpop.f32.mrb[11].mxu0  ;;  %v473_v46 = vadd.f32 %v467_v41, %v359_v20 }
 0x8a2   :  { %v477_v47 = vsel %vm281_vm11, %v473_v46, 0.0  ;;  %v474_v48 = vadd.f32 %v470_v44, %v360_v21 }
 0x8a3   :  { %478 = vadd.xlane.f32.xlu1 %v477_v47 }
 0x8a4   :  { %v480_v51 = vsel %vm281_vm11, %v474_v48, 0.0 }
 0x8a7   :  { %481 = vadd.xlane.f32.xlu1 %v480_v51 }
 0x930   :  { %v479_v52 = vpop.xlane.xlu1 %478 }
 0x931   :  { %v483_v53 = vmul.f32 0.03125, %v479_v52 }
 0x933   :  { %v485_v54 = vsub.f32 %v473_v46, %v483_v53 }
 0x934   :  { %v482_v55 = vpop.xlane.xlu1 %481 }
 0x935   :  { %v484_v56 = vmul.f32 0.03125, %v482_v55  ;;  %v487_v57 = vmul.f32 %v485_v54, %v485_v54 }
 0x937   :  { %v486_v49 = vsub.f32 %v474_v48, %v484_v56  ;;  %v489_v58 = vsel %vm281_vm11, %v487_v57, 0.0 }
 0x938   :  { %490 = vadd.xlane.f32.xlu0 %v489_v58 }
 0x939   :  { %v488_v50 = vmul.f32 %v486_v49, %v486_v49 }
 0x93b   :  { %v492_v59 = vsel %vm281_vm11, %v488_v50, 0.0 }
 0x93c   :  { %493 = vadd.xlane.f32.xlu1 %v492_v59 }
 0x9c5   :  { %v491_v2 = vpop.xlane.xlu0 %490 }
 0x9c6   :  { %v495_v3 = vmul.f32 0.03125, %v491_v2 }
 0x9c8   :  { %v497_v4 = vadd.f32 1e-05, %v495_v3 }
 0x9c9   :  { %v494_v5 = vpop.xlane.xlu1 %493 }
 0x9ca   :  { %679 = vrsqrt.f32 %v497_v4  ;;  %v496_v6 = vmul.f32 0.03125, %v494_v5 }
 0x9cc   :  { %v498_v7 = vadd.f32 1e-05, %v496_v6 }
 0x9ce   :  { %681 = vrsqrt.f32 %v498_v7 }
 0x9d4   :  { %v680_v8 = vpop.eup %679 }
 0x9d5   :  { %v501_v9 = vmul.f32 %v680_v8, %v485_v54 }
 0x9d7   :  { %v503_v12 = vmul.f32 %v501_v9, %v475_v10 }
 0x9d8   :  { %v682_v11 = vpop.eup %681 }
 0x9d9   :  { %v502_v13 = vmul.f32 %v682_v11, %v486_v49  ;;  %v505_v16 = vadd.f32 %v503_v12, %v476_v15 }
 0x9db   :  { %v504_v14 = vmul.f32 %v502_v13, %v475_v10 }
 0x9dd   :  { %v506_v17 = vadd.f32 %v504_v14, %v476_v15 }
 0x9df   :  { %v513_v18 = vpack.c.bf16 %v506_v17, %v505_v16 }
 0x9e1   :  { %650 = vmatmul.mubr.msk.bf16.vlgmr.msra.gmra.mrb[12].mxu1 %vm281_vm11, %v513_v18 }
 0xab4   :  { %v552_v20 = vpop.f32.mrb[12].mxu1 }
 0xab5   :  { %v553_v21 = vadd.f32 %v552_v20, %v514_v19  ;;  %v651_v22 = vpop.f32.mrb[13].mxu1 }
 0xab6   :  { %v555_v23 = vpop.f32.mrb[14].mxu1 }
 0xab7   :  { %559 = vst.msk [vmem:[#allocation5] sm:$0xff] %vm202_vm9, %v553_v21  ;;  %v556_v24 = vadd.f32 %v555_v23, %v514_v19  ;;  %v652_v25 = vpop.f32.mrb[15].mxu1 }
 0xab9   :  { %560 = vst.msk [vmem:[#allocation5 + $0x8] sm:$0xff] %vm202_vm9, %v556_v24 }
 0xaba   :  { %716 = shalt.err (!%p713_p12)
}
 0xabb   :  { %s717_s3 = scalar_lea.hbm %s847_s2, 256 }
 0xabc   :  { %p718_p13 = scmp.ne.s32.totalorder %s847_s2, %s717_s3  ;;  %p721_p0 = scmp.lt.u32.totalorder %s717_s3, %s847_s2 }
 0xabe   :  { %p723_p1 = pnand %p721_p0, %p718_p13 }
 0xac0   :  { %726 = shalt.err (!%p723_p1)
}
 0xac1   :  { %s740_s8 = smov 128   ;;  %s741_s9 = smov 8  }
 0xac2   :  { %572 = dma.vmem_to_hbm [thread:$0]  %s567_s27, 256, %s847_s2, [#allocation4], %s740_s8, %s740_s8, %s741_s9  }
 0xac3   :  { %729 = dma.done.wait [#allocation4], 256  }
 0xac4   :  { %730 = vsyncadd [#allocation4], 4294967040 }
 0xac5   :  { %576 = vsyncpa [#allocation3], 1 }
 0xac6   :  { %577 = vsyncpa [#allocation4], 1 }

</bundles_post_ra>
